<compile_context>
chip_gen: v6e
topology: v6e:2x2x1
jax: 0.10.0
libtpu: 0.0.40
codegen_flags: <defaults>
</compile_context>

<pallas_src>
import functools
import math

import jax
import jax.numpy as jnp
from jax.experimental import pallas as pl
from jax.experimental.pallas import tpu as pltpu


# ------------------------- per-generation defaults --------------------------

@functools.lru_cache(maxsize=None)
def _kernel_defaults():
    """Tile sizes / scoped-VMEM budget gated on the local chip generation.
    v5e/v6e have 128 MiB VMEM per TensorCore -> large tiles; v7x has 64 MiB
    (and 3.2 TB/s HBM) -> keep the scoped request <= ~48 MiB."""
    vmem_bytes = 64 * 1024 * 1024            # conservative (v7x-safe) fallback
    try:
        info = pltpu.get_tpu_info()
        vmem_bytes = int(getattr(info, "vmem_capacity_bytes", vmem_bytes))
    except Exception:
        pass
    if vmem_bytes >= 128 * 1024 * 1024:       # v5e / v6e
        return dict(vmem_limit=100 * 1024 * 1024,
                    tile_m=512, tile_n=512, tile_k=1024,
                    lm_tile_m=1024, attn_block_t=512)
    return dict(vmem_limit=48 * 1024 * 1024,  # v7x (64 MiB / TC)
                tile_m=256, tile_n=512, tile_k=512,
                lm_tile_m=512, attn_block_t=256)


def _pick_tile(dim, desired, align):
    """Largest tile <= desired that is a multiple of `align` and divides `dim`,
    falling back to the full dimension (always legal for a BlockSpec)."""
    if dim <= desired:
        return dim
    t = (desired // align) * align
    while t >= align:
        if dim % t == 0:
            return t
        t -= align
    return dim


def _largest_divisor_leq(n, cap):
    for d in range(max(1, min(n, cap)), 0, -1):
        if n % d == 0:
            return d
    return 1


# ----------------------------- Pallas kernels -------------------------------

def _make_ln_matmul_kernel(activation, has_bias, transpose_rhs):
    """Fused: y = act(LayerNorm(x) @ W (+ bias)).  The LN prologue runs only at
    j == 0 (per row tile) and its bf16 result is cached in a VMEM scratch that
    is reused for every output-column tile j."""

    def kernel(*refs):
        if has_bias:
            x_ref, g_ref, bln_ref, w_ref, bias_ref, o_ref, xn_ref = refs
        else:
            x_ref, g_ref, bln_ref, w_ref, o_ref, xn_ref = refs
            bias_ref = None

        @pl.when(pl.program_id(1) == 0)          # new row tile: (re)compute LN
        def _():
            x = x_ref[...].astype(jnp.float32)   # LN statistics always in f32
            mu = jnp.mean(x, axis=-1, keepdims=True)
            var = jnp.mean((x - mu) * (x - mu), axis=-1, keepdims=True)
            xn = (x - mu) * jax.lax.rsqrt(var + 1e-5)
            xn = xn * g_ref[...].astype(jnp.float32) + bln_ref[...].astype(jnp.float32)
            xn_ref[...] = xn.astype(xn_ref.dtype)    # bf16 MXU operand, cached

        xn = xn_ref[...]
        if transpose_rhs:
            # contract last dims directly (A @ B^T): no XLU transpose of W and
            # no materialized wte.T in HBM.
            y = jax.lax.dot_general(
                xn, w_ref[...], (((1,), (1,)), ((), ())),
                preferred_element_type=jnp.float32)
        else:
            y = jnp.dot(xn, w_ref[...], preferred_element_type=jnp.float32)

        if bias_ref is not None:
            y = y + bias_ref[...].astype(jnp.float32)
        if activation == "gelu_new":                 # HF GPT-2 tanh approximation
            c = 0.7978845608028654                   # sqrt(2 / pi)
            y = 0.5 * y * (1.0 + jnp.tanh(c * (y + 0.044715 * y * y * y)))
        o_ref[...] = y.astype(o_ref.dtype)

    return kernel


def _make_matmul_bias_kernel(has_residual):
    """K-tiled matmul with an f32 VMEM accumulator; bias (+ f32 residual add)
    applied in the k==last epilogue."""

    def kernel(*refs):
        if has_residual:
            x_ref, w_ref, b_ref, r_ref, o_ref, acc_ref = refs
        else:
            x_ref, w_ref, b_ref, o_ref, acc_ref = refs
            r_ref = None
        kk = pl.program_id(2)

        @pl.when(kk == 0)
        def _():
            acc_ref[...] = jnp.zeros_like(acc_ref)

        acc_ref[...] += jnp.dot(x_ref[...], w_ref[...],
                                preferred_element_type=jnp.float32)

        @pl.when(kk == pl.num_programs(2) - 1)
        def _():
            y = acc_ref[...] + b_ref[...].astype(jnp.float32)
            if r_ref is not None:
                y = y + r_ref[...].astype(jnp.float32)   # residual add in f32
            o_ref[...] = y.astype(o_ref.dtype)

    return kernel


def _make_flash_attn_kernel(scale, hp, dh):
    """Flash-style causal attention processing `hp` heads per grid step.
    Q/K/V blocks are (1, bt, hp*dh) slices taken straight out of the fused
    [B, T, 3D] QKV activation; the output block writes [B, T, D] directly."""

    def kernel(q_ref, k_ref, v_ref, o_ref, m_scr, l_scr, acc_scr):
        qi = pl.program_id(2)
        ki = pl.program_id(3)

        @pl.when(ki == 0)
        def _():
            m_scr[...] = jnp.full_like(m_scr, -1e30)
            l_scr[...] = jnp.zeros_like(l_scr)
            acc_scr[...] = jnp.zeros_like(acc_scr)

        def process(apply_mask):
            # 1/sqrt(dh) folded into q once per kv step: O(bt*hp*dh) instead of
            # O(bt*tkv) per head; exact in bf16 for power-of-two head dims.
            q = q_ref[0] * scale               # (bt, hp*dh) bf16
            k = k_ref[0]
            v = v_ref[0]
            for h in range(hp):                # static unroll over packed heads
                sl = slice(h * dh, (h + 1) * dh)
                # contract last dims directly -> no XLU transpose of K.
                s = jax.lax.dot_general(
                    q[:, sl], k[:, sl], (((1,), (1,)), ((), ())),
                    preferred_element_type=jnp.float32)          # (bt, bt) f32
                if apply_mask:   # only the diagonal block needs the causal mask
                    row = jax.lax.broadcasted_iota(jnp.int32, s.shape, 0)
                    col = jax.lax.broadcasted_iota(jnp.int32, s.shape, 1)
                    s = jnp.where(col <= row, s, -1e30)
                m_prev = m_scr[h]
                m_new = jnp.maximum(m_prev, jnp.max(s, axis=-1, keepdims=True))
                alpha = jnp.exp(m_prev - m_new)
                p = jnp.exp(s - m_new)
                l_scr[h] = alpha * l_scr[h] + jnp.sum(p, axis=-1, keepdims=True)
                acc_scr[h] = alpha * acc_scr[h] + jnp.dot(
                    p.astype(v.dtype), v[:, sl],
                    preferred_element_type=jnp.float32)
                m_scr[h] = m_new

        @pl.when(ki < qi)          # strictly-below-diagonal blocks: no mask
        def _():
            process(False)

        @pl.when(ki == qi)         # diagonal block: apply causal mask
        def _():
            process(True)

        @pl.when(ki == pl.num_programs(3) - 1)
        def _():
            for h in range(hp):
                inv = pl.reciprocal(l_scr[h], approx=True)   # EUP slot, ~free
                o_ref[0, :, h * dh:(h + 1) * dh] = (
                    acc_scr[h] * inv).astype(o_ref.dtype)

    return kernel


# ------------------------------ kernel wrappers ------------------------------

def pallas_ln_matmul(x, gamma, beta, w, bias=None, activation=None,
                     transpose_rhs=False, out_dtype=jnp.bfloat16,
                     tile_m=None, tile_n=None, vmem_limit=None):
    """act(LayerNorm(x) @ W (+ bias)), tiled over (rows, out-features)."""
    dflt = _kernel_defaults()
    tile_m = tile_m or dflt["tile_m"]
    tile_n = tile_n or dflt["tile_n"]
    vmem_limit = vmem_limit or dflt["vmem_limit"]

    n, d = x.shape
    n_out = w.shape[0] if transpose_rhs else w.shape[1]
    tm = _pick_tile(n, tile_m, 8)
    tn = _pick_tile(n_out, tile_n, 128)
    grid = (n // tm, n_out // tn)

    in_specs = [
        pl.BlockSpec((tm, d), lambda i, j: (i, 0)),
        pl.BlockSpec((1, d), lambda i, j: (0, 0)),
        pl.BlockSpec((1, d), lambda i, j: (0, 0)),
    ]
    if transpose_rhs:
        in_specs.append(pl.BlockSpec((tn, d), lambda i, j: (j, 0)))
    else:
        in_specs.append(pl.BlockSpec((d, tn), lambda i, j: (0, j)))
    args = [x, gamma.reshape(1, d), beta.reshape(1, d), w]
    if bias is not None:
        in_specs.append(pl.BlockSpec((1, tn), lambda i, j: (0, j)))
        args.append(bias.reshape(1, n_out))

    kernel = _make_ln_matmul_kernel(activation, bias is not None, transpose_rhs)
    # j must stay the sequential inner axis ("arbitrary") so the LN scratch
    # computed at j==0 is valid for every j of the same row tile i.
    return pl.pallas_call(
        kernel,
        out_shape=jax.ShapeDtypeStruct((n, n_out), out_dtype),
        grid=grid,
        in_specs=in_specs,
        out_specs=pl.BlockSpec((tm, tn), lambda i, j: (i, j)),
        scratch_shapes=[pltpu.VMEM((tm, d), w.dtype)],
        compiler_params=pltpu.CompilerParams(
            dimension_semantics=("parallel", "arbitrary"),
            vmem_limit_bytes=vmem_limit),
    )(*args)


def pallas_matmul_bias(x, w, bias, residual=None, out_dtype=jnp.float32,
                       tile_m=None, tile_n=None, tile_k=None, vmem_limit=None):
    """x @ w + bias (+ residual), tiled (M, N, K) with an f32 VMEM accumulator."""
    dflt = _kernel_defaults()
    tile_m = tile_m or dflt["tile_m"]
    tile_n = tile_n or dflt["tile_n"]
    tile_k = tile_k or dflt["tile_k"]
    vmem_limit = vmem_limit or dflt["vmem_limit"]

    n, k = x.shape
    m_out = w.shape[1]
    tm = _pick_tile(n, tile_m, 8)
    tn = _pick_tile(m_out, tile_n, 128)
    tk = _pick_tile(k, tile_k, 128)
    grid = (n // tm, m_out // tn, k // tk)

    in_specs = [
        pl.BlockSpec((tm, tk), lambda i, j, kk: (i, kk)),
        pl.BlockSpec((tk, tn), lambda i, j, kk: (kk, j)),
        pl.BlockSpec((1, tn), lambda i, j, kk: (0, j)),
    ]
    args = [x, w, bias.reshape(1, m_out)]
    if residual is not None:
        in_specs.append(pl.BlockSpec((tm, tn), lambda i, j, kk: (i, j)))
        args.append(residual)

    kernel = _make_matmul_bias_kernel(residual is not None)
    return pl.pallas_call(
        kernel,
        out_shape=jax.ShapeDtypeStruct((n, m_out), out_dtype),
        grid=grid,
        in_specs=in_specs,
        out_specs=pl.BlockSpec((tm, tn), lambda i, j, kk: (i, j)),
        scratch_shapes=[pltpu.VMEM((tm, tn), jnp.float32)],
        compiler_params=pltpu.CompilerParams(
            dimension_semantics=("parallel", "parallel", "arbitrary"),
            vmem_limit_bytes=vmem_limit),
    )(*args)


def pallas_flash_attention(qkv, n_head, head_dim, block_t=None, vmem_limit=None):
    """Causal flash attention reading straight from the fused QKV activation
    [B, T, 3*D] (D = n_head * head_dim) and writing [B, T, D] head-major."""
    dflt = _kernel_defaults()
    block_t = block_t or dflt["attn_block_t"]
    vmem_limit = vmem_limit or dflt["vmem_limit"]

    B, T, three_d = qkv.shape
    D = three_d // 3
    dh = head_dim
    # Pack heads so the feature block is (ideally) 128 lanes wide -> lane-dense
    # q/k/v loads and output stores, bigger MXU ops, fewer grid steps.
    target = max(1, 128 // dh) if dh < 128 else 1
    hp = _largest_divisor_leq(n_head, target)
    # TODO(synk): odd head counts with dh < 128 (e.g. GPT-2 XL, H=25) leave
    # hp*dh lane-sparse; packing non-adjacent heads is not expressible with a
    # contiguous BlockSpec slice of the fused QKV layout.
    G = n_head // hp
    bw = hp * dh
    bt = _pick_tile(T, block_t, 8)
    nt = T // bt
    scale = 1.0 / math.sqrt(dh)

    q_spec = pl.BlockSpec((1, bt, bw), lambda b, g, qi, ki: (b, qi, g))
    # Clamp the kv block index on skipped (above-diagonal) steps so the DMA is
    # elided (same block index as the previous step).
    k_spec = pl.BlockSpec((1, bt, bw),
                          lambda b, g, qi, ki: (b, jnp.minimum(ki, qi), G + g))
    v_spec = pl.BlockSpec((1, bt, bw),
                          lambda b, g, qi, ki: (b, jnp.minimum(ki, qi), 2 * G + g))
    o_spec = pl.BlockSpec((1, bt, bw), lambda b, g, qi, ki: (b, qi, g))

    kernel = _make_flash_attn_kernel(scale, hp, dh)
    return pl.pallas_call(
        kernel,
        out_shape=jax.ShapeDtypeStruct((B, T, D), qkv.dtype),
        grid=(B, G, nt, nt),
        in_specs=[q_spec, k_spec, v_spec],
        out_specs=o_spec,
        scratch_shapes=[
            pltpu.VMEM((hp, bt, 1), jnp.float32),    # m (running max)
            pltpu.VMEM((hp, bt, 1), jnp.float32),    # l (running denom)
            pltpu.VMEM((hp, bt, dh), jnp.float32),   # acc
        ],
        compiler_params=pltpu.CompilerParams(
            dimension_semantics=("parallel", "parallel", "parallel", "arbitrary"),
            vmem_limit_bytes=vmem_limit),
    )(qkv, qkv, qkv)


# ------------------------------- GPT-2 forward -------------------------------

def gpt2_forward(input_ids, params, cfg):
    dflt = _kernel_defaults()
    B, T = input_ids.shape
    D, H, V = cfg["d_model"], cfg["n_head"], cfg["vocab"]
    Dh = D // H
    N = B * T

    # embedding gather + positional add: XLA glue
    h = params["wte"][input_ids] + params["wpe"][:T][None, :, :]   # [B, T, D]
    x = h.reshape(N, D).astype(jnp.float32)     # residual stream kept in f32

    for blk in params["blocks"]:
        # --- attention: fused LN1 + QKV projection (bf16 out, [N, 3D]) ---
        qkv = pallas_ln_matmul(x, blk["ln1_g"], blk["ln1_b"],
                               blk["attn_w"], blk["attn_b"])
        # flash attention reads head slices straight out of qkv (free reshape,
        # no split / transposes) and writes [B, T, D] head-major.
        attn = pallas_flash_attention(qkv.reshape(B, T, 3 * D), H, Dh)
        # --- fused out-projection + residual add (f32) ---
        x = pallas_matmul_bias(attn.reshape(N, D), blk["proj_w"], blk["proj_b"],
                               residual=x)                              # [N, D]

        # --- MLP: fused LN2 + fc + gelu_new, then fc2 + residual ---
        ff = pallas_ln_matmul(x, blk["ln2_g"], blk["ln2_b"],
                              blk["fc_w"], blk["fc_b"], activation="gelu_new")
        x = pallas_matmul_bias(ff, blk["fc2_w"], blk["fc2_b"], residual=x)

    # --- fused final LN + tied lm_head: wte kept [V_pad, D] (rows padded to a
    # multiple of 128 -> lane-dense tiles), larger row tile (weight re-streamed
    # fewer times), LN computed once per row tile.
    logits = pallas_ln_matmul(x, params["lnf_g"], params["lnf_b"],
                              params["wte_lm"], bias=None,
                              transpose_rhs=True, out_dtype=jnp.float32,
                              tile_m=dflt["lm_tile_m"])
    logits = logits[:, :V]                       # drop padded vocab columns
    return logits.reshape(B, T, V)


# --------------------------- pure-JAX reference ------------------------------

def gpt2_forward_ref(input_ids, params, cfg):
    B, T = input_ids.shape
    D, H, V = cfg["d_model"], cfg["n_head"], cfg["vocab"]
    Dh = D // H

    def ln(x, g, b):
        mu = jnp.mean(x, axis=-1, keepdims=True)
        var = jnp.mean((x - mu) ** 2, axis=-1, keepdims=True)
        return (x - mu) * jax.lax.rsqrt(var + 1e-5) * g + b

    def gelu_new(y):
        c = math.sqrt(2.0 / math.pi)
        return 0.5 * y * (1.0 + jnp.tanh(c * (y + 0.044715 * y ** 3)))

    x = (params["wte"][input_ids] + params["wpe"][:T][None]).astype(jnp.float32)
    for blk in params["blocks"]:
        h = ln(x, blk["ln1_g"], blk["ln1_b"])
        qkv = h @ blk["attn_w"] + blk["attn_b"]
        q, k, v = jnp.split(qkv, 3, axis=-1)
        q = q.reshape(B, T, H, Dh).transpose(0, 2, 1, 3)
        k = k.reshape(B, T, H, Dh).transpose(0, 2, 1, 3)
        v = v.reshape(B, T, H, Dh).transpose(0, 2, 1, 3)
        s = jnp.einsum("bhqd,bhkd->bhqk", q, k) / math.sqrt(Dh)
        mask = jnp.tril(jnp.ones((T, T), bool))
        s = jnp.where(mask[None, None], s, -1e30)
        p = jax.nn.softmax(s, axis=-1)
        a = jnp.einsum("bhqk,bhkd->bhqd", p, v).transpose(0, 2, 1, 3).reshape(B, T, D)
        x = x + (a @ blk["proj_w"] + blk["proj_b"])
        h = ln(x, blk["ln2_g"], blk["ln2_b"])
        ff = gelu_new(h @ blk["fc_w"] + blk["fc_b"])
        x = x + (ff @ blk["fc2_w"] + blk["fc2_b"])
    x = ln(x, params["lnf_g"], params["lnf_b"])
    return x @ params["wte"].T


# ---------------------------------- params -----------------------------------

def init_params(key, cfg):
    D, V, L = cfg["d_model"], cfg["vocab"], cfg["n_layer"]
    Dm = 4 * D
    keys = iter(jax.random.split(key, 4 + 8 * L))

    def w(shape, scale=0.02):
        return (scale * jax.random.normal(next(keys), shape)).astype(jnp.float32)

    params = {
        "wte": w((V, D)),
        "wpe": w((cfg["n_ctx"], D)),
        "lnf_g": jnp.ones((D,), jnp.float32),
        "lnf_b": jnp.zeros((D,), jnp.float32),
        "blocks": [],
    }
    for _ in range(L):
        params["blocks"].append({
            "ln1_g": jnp.ones((D,), jnp.float32),
            "ln1_b": jnp.zeros((D,), jnp.float32),
            "attn_w": w((D, 3 * D)),
            "attn_b": w((3 * D,)),
            "proj_w": w((D, D)),
            "proj_b": w((D,)),
            "ln2_g": jnp.ones((D,), jnp.float32),
            "ln2_b": jnp.zeros((D,), jnp.float32),
            "fc_w": w((D, Dm)),
            "fc_b": w((Dm,)),
            "fc2_w": w((Dm, D)),
            "fc2_b": w((D,)),
        })
    return params


def cast_params_for_kernels(params):
    """bf16 copies of the MXU weight matrices, created ONCE outside forward();
    biases / LN params / embedding table stay f32.  The tied lm_head weight is
    zero-padded along vocab to a multiple of 128 so its tiles stay lane-dense
    even for real vocab sizes (50257 -> 50304)."""
    wte = params["wte"]
    V, D = wte.shape
    V_pad = ((V + 127) // 128) * 128
    wte_lm = wte.astype(jnp.bfloat16)
    if V_pad != V:
        wte_lm = jnp.pad(wte_lm, ((0, V_pad - V), (0, 0)))
    kp = {
        "wte": wte,
        "wpe": params["wpe"],
        "wte_lm": wte_lm,                       # tied lm_head, [V_pad, D] bf16
        "lnf_g": params["lnf_g"],
        "lnf_b": params["lnf_b"],
        "blocks": [],
    }
    for blk in params["blocks"]:
        nb = dict(blk)
        for name in ("attn_w", "proj_w", "fc_w", "fc2_w"):
            nb[name] = blk[name].astype(jnp.bfloat16)
        kp["blocks"].append(nb)
    return kp


# ----------------------------------- main ------------------------------------

if __name__ == "__main__":
    # Small but layout-realistic shapes: Dh=64 like real GPT-2, so the attention
    # kernel exercises the lane-dense 2-heads-per-step (128-lane) path.
    cfg = dict(vocab=64, n_ctx=16, d_model=128, n_head=2, n_layer=2)
    B, T = 2, 8

    key = jax.random.PRNGKey(0)
    k_param, k_ids = jax.random.split(key)
    params = init_params(k_param, cfg)
    kparams = cast_params_for_kernels(params)
    input_ids = jax.random.randint(k_ids, (B, T), 0, cfg["vocab"], dtype=jnp.int32)

    logits = gpt2_forward(input_ids, kparams, cfg)
    logits = jax.block_until_ready(logits)

    ref = gpt2_forward_ref(input_ids, params, cfg)
    assert logits.shape == (B, T, cfg["vocab"])
    max_diff = float(jnp.max(jnp.abs(logits - ref)))
    assert jnp.allclose(logits, ref, atol=1e-2, rtol=1e-2), (
        "mismatch vs reference, max abs diff = %e" % max_diff)

    # TODO(synk): tokenizer / autoregressive generate() (beam & nucleus sampling)
    # are host-side control flow, not kernel work; only forward() is implemented.
    print("KERNEL_OK")
</pallas_src>

<mosaic_0001>
module attributes {stable_mosaic.version = 11 : i64} {
  func.func @kernel(%arg0: i32, %arg1: i32, %arg2: memref<16x128xf32, #tpu.memory_space<vmem>>, %arg3: memref<1x128xf32, #tpu.memory_space<vmem>>, %arg4: memref<1x128xf32, #tpu.memory_space<vmem>>, %arg5: memref<128x384xbf16, #tpu.memory_space<vmem>>, %arg6: memref<1x384xf32, #tpu.memory_space<vmem>>, %arg7: memref<16x384xbf16, #tpu.memory_space<vmem>>, %arg8: memref<16x128xbf16, #tpu.memory_space<vmem>>) attributes {dimension_semantics = [#tpu.dimension_semantics<parallel>, #tpu.dimension_semantics<arbitrary>], iteration_bounds = array<i64: 1, 1>, scalar_prefetch = 0 : i64, scratch_operands = 1 : i64, tpu.core_type = #tpu.core_type<tc>, window_params = [{transform_indices = @transform_0, window_bounds = array<i64: 16, 128>}, {pipeline_mode = #tpu.pipeline_mode<synchronous>, transform_indices = @transform_1, window_bounds = array<i64: 1, 128>}, {pipeline_mode = #tpu.pipeline_mode<synchronous>, transform_indices = @transform_2, window_bounds = array<i64: 1, 128>}, {transform_indices = @transform_3, window_bounds = array<i64: 128, 384>}, {transform_indices = @transform_4, window_bounds = array<i64: 1, 384>}, {transform_indices = @transform_5, window_bounds = array<i64: 16, 384>}]} {
    %c0_i32 = arith.constant 0 : i32
    %0 = arith.cmpi eq, %arg1, %c0_i32 : i32
    %1 = arith.extui %0 : i1 to i32
    %c0_i32_0 = arith.constant 0 : i32
    %2 = arith.cmpi ne, %1, %c0_i32_0 : i32
    scf.if %2 {
      %c0_8 = arith.constant 0 : index
      %c0_9 = arith.constant 0 : index
      %11 = vector.load %arg2[%c0_8, %c0_9] : memref<16x128xf32, #tpu.memory_space<vmem>>, vector<16x128xf32>
      %cst_10 = arith.constant dense<0.000000e+00> : vector<16xf32>
      %12 = vector.multi_reduction <add>, %11, %cst_10 [1] : vector<16x128xf32> to vector<16xf32>
      %13 = vector.shape_cast %12 : vector<16xf32> to vector<16x1xf32>
      %cst_11 = arith.constant 1.280000e+02 : f32
      %14 = vector.broadcast %cst_11 : f32 to vector<16x1xf32>
      %15 = arith.divf %13, %14 : vector<16x1xf32>
      %16 = vector.broadcast %15 : vector<16x1xf32> to vector<16x128xf32>
      %17 = arith.subf %11, %16 : vector<16x128xf32>
      %18 = vector.broadcast %15 : vector<16x1xf32> to vector<16x128xf32>
      %19 = arith.subf %11, %18 : vector<16x128xf32>
      %20 = arith.mulf %17, %19 : vector<16x128xf32>
      %cst_12 = arith.constant dense<0.000000e+00> : vector<16xf32>
      %21 = vector.multi_reduction <add>, %20, %cst_12 [1] : vector<16x128xf32> to vector<16xf32>
      %22 = vector.shape_cast %21 : vector<16xf32> to vector<16x1xf32>
      %cst_13 = arith.constant 1.280000e+02 : f32
      %23 = vector.broadcast %cst_13 : f32 to vector<16x1xf32>
      %24 = arith.divf %22, %23 : vector<16x1xf32>
      %25 = vector.broadcast %15 : vector<16x1xf32> to vector<16x128xf32>
      %26 = arith.subf %11, %25 : vector<16x128xf32>
      %cst_14 = arith.constant 9.99999974E-6 : f32
      %27 = vector.broadcast %cst_14 : f32 to vector<16x1xf32>
      %28 = arith.addf %24, %27 : vector<16x1xf32>
      %29 = math.rsqrt %28 : vector<16x1xf32>
      %30 = vector.broadcast %29 : vector<16x1xf32> to vector<16x128xf32>
      %31 = arith.mulf %26, %30 : vector<16x128xf32>
      %c0_15 = arith.constant 0 : index
      %c0_16 = arith.constant 0 : index
      %32 = vector.load %arg3[%c0_15, %c0_16] : memref<1x128xf32, #tpu.memory_space<vmem>>, vector<1x128xf32>
      %33 = vector.broadcast %32 : vector<1x128xf32> to vector<16x128xf32>
      %34 = arith.mulf %31, %33 : vector<16x128xf32>
      %c0_17 = arith.constant 0 : index
      %c0_18 = arith.constant 0 : index
      %35 = vector.load %arg4[%c0_17, %c0_18] : memref<1x128xf32, #tpu.memory_space<vmem>>, vector<1x128xf32>
      %36 = vector.broadcast %35 : vector<1x128xf32> to vector<16x128xf32>
      %37 = arith.addf %34, %36 : vector<16x128xf32>
      %38 = arith.truncf %37 : vector<16x128xf32> to vector<16x128xbf16>
      %c0_19 = arith.constant 0 : index
      %c0_20 = arith.constant 0 : index
      %39 = vector.load %arg8[%c0_19, %c0_20] : memref<16x128xbf16, #tpu.memory_space<vmem>>, vector<16x128xbf16>
      tpu.vector_store %arg8[%c0_19, %c0_20], %38 {strides = array<i32>} : memref<16x128xbf16, #tpu.memory_space<vmem>>, vector<16x128xbf16>,
    } else {
    }
    %c0 = arith.constant 0 : index
    %c0_1 = arith.constant 0 : index
    %3 = vector.load %arg8[%c0, %c0_1] : memref<16x128xbf16, #tpu.memory_space<vmem>>, vector<16x128xbf16>
    %c0_2 = arith.constant 0 : index
    %c0_3 = arith.constant 0 : index
    %4 = vector.load %arg5[%c0_2, %c0_3] : memref<128x384xbf16, #tpu.memory_space<vmem>>, vector<128x384xbf16>
    %cst = arith.constant dense<0.000000e+00> : vector<16x384xf32>
    %5 = tpu.matmul %3, %4, %cst {dimension_numbers = #tpu.dot_dimension_numbers<[1], [0], [0], [1], [0, 0, 1, 1], [], []>} : vector<16x128xbf16>, vector<128x384xbf16>, vector<16x384xf32> -> vector<16x384xf32>
    %c0_4 = arith.constant 0 : index
    %c0_5 = arith.constant 0 : index
    %6 = vector.load %arg6[%c0_4, %c0_5] : memref<1x384xf32, #tpu.memory_space<vmem>>, vector<1x384xf32>
    %7 = vector.broadcast %6 : vector<1x384xf32> to vector<16x384xf32>
    %8 = arith.addf %5, %7 : vector<16x384xf32>
    %9 = arith.truncf %8 : vector<16x384xf32> to vector<16x384xbf16>
    %c0_6 = arith.constant 0 : index
    %c0_7 = arith.constant 0 : index
    %10 = vector.load %arg7[%c0_6, %c0_7] : memref<16x384xbf16, #tpu.memory_space<vmem>>, vector<16x384xbf16>
    tpu.vector_store %arg7[%c0_6, %c0_7], %9 {strides = array<i32>} : memref<16x384xbf16, #tpu.memory_space<vmem>>, vector<16x384xbf16>,
    return
  }
  func.func @transform_0(%arg0: i32, %arg1: i32) -> (i32, i32) {
    %c0_i32 = arith.constant 0 : i32
    %c0_i32_0 = arith.constant 0 : i32
    return %arg0, %c0_i32 : i32, i32
  }
  func.func @transform_1(%arg0: i32, %arg1: i32) -> (i32, i32) {
    %c0_i32 = arith.constant 0 : i32
    %c0_i32_0 = arith.constant 0 : i32
    %c0_i32_1 = arith.constant 0 : i32
    return %c0_i32, %c0_i32_0 : i32, i32
  }
  func.func @transform_2(%arg0: i32, %arg1: i32) -> (i32, i32) {
    %c0_i32 = arith.constant 0 : i32
    %c0_i32_0 = arith.constant 0 : i32
    %c0_i32_1 = arith.constant 0 : i32
    return %c0_i32, %c0_i32_0 : i32, i32
  }
  func.func @transform_3(%arg0: i32, %arg1: i32) -> (i32, i32) {
    %c0_i32 = arith.constant 0 : i32
    %c0_i32_0 = arith.constant 0 : i32
    return %c0_i32, %arg1 : i32, i32
  }
  func.func @transform_4(%arg0: i32, %arg1: i32) -> (i32, i32) {
    %c0_i32 = arith.constant 0 : i32
    %c0_i32_0 = arith.constant 0 : i32
    return %c0_i32, %arg1 : i32, i32
  }
  func.func @transform_5(%arg0: i32, %arg1: i32) -> (i32, i32) {
    %c0_i32 = arith.constant 0 : i32
    return %arg0, %arg1 : i32, i32
  }
}

</mosaic_0001>

<bundles_post_ra>
// kernel: tpu_custom_call.1
= control target key start
LH: loop header
LB: loop body
LE: loop exit
PB: predicated region body
PF: predicated region fallthrough
CT: control target
= control target key end

     0   :  { %10 = vsyncpa [#allocation4], 0  ;;  %s678_s0 = inlined_call_operand.hbm [shape: f32[16,128], index: 0, kind: input, shape index: {}]   ;;  %s679_s1 = inlined_call_operand.vmem [shape: f32[1,128], index: 1, kind: input, shape index: {}]   ;;  %s680_s2 = inlined_call_operand.vmem [shape: f32[1,128], index: 2, kind: input, shape index: {}]   ;;  %s681_s3 = inlined_call_operand.hbm [shape: bf16[128,384], index: 3, kind: input, shape index: {}]   ;;  %s682_s4 = inlined_call_operand.vmem [shape: f32[1,384], index: 4, kind: input, shape index: {}]   ;;  %s683_s5 = inlined_call_operand.hbm [shape: bf16[16,384], index: 5, kind: output, shape index: {}]  }
   0x1   :  { %11 = vsyncpa [#allocation7], 0 }
   0x2   :  { %12 = vsyncpa [#allocation5], 0  ;;  %s604_s18 = smov [#allocation3]  }
   0x3   :  { %s18_s19 = sshll.u32 %s604_s18, 4  ;;  %s19_s19 = int_to_ptr.vmem [resolvable:$true] %s18_s19 }
   0x4   :  { %s546_s20 = scalar_lea.vmem %s19_s19, 256  ;;  %p551_p1 = scmp.lt.s32.totalorder %s19_s19, %s19_s19 }
   0x5   :  { %p547_p0 = scmp.ne.s32.totalorder %s19_s19, %s546_s20  ;;  %p552_p2 = scmp.lt.s32.totalorder %s546_s20, %s546_s20 }
   0x7   :  { %p553_p3 = por %p552_p2, %p551_p1 }
   0x9   :  { %p554_p4 = pnand %p553_p3, %p547_p0 }
   0xb   :  { %557 = shalt.err (!%p554_p4)
}
   0xc   :  { %s605_s21 = smov 128   ;;  %s606_s22 = smov 8  }
   0xd   :  { %24 = dma.hbm_to_vmem [thread:$0]  %s678_s0, 256, %s19_s19, [#allocation4], %s605_s21, %s605_s21, %s606_s22  }
   0xe   :  { %s607_s25 = smov [#allocation6]  }
   0xf   :  { %s34_s26 = sshll.u32 %s607_s25, 4  ;;  %s35_s26 = int_to_ptr.vmem [resolvable:$true] %s34_s26 }
  0x10   :  { %s566_s27 = scalar_lea.vmem %s35_s26, 3072  ;;  %p571_p6 = scmp.lt.s32.totalorder %s35_s26, %s35_s26 }
  0x11   :  { %p567_p5 = scmp.ne.s32.totalorder %s35_s26, %s566_s27  ;;  %p572_p7 = scmp.lt.s32.totalorder %s566_s27, %s566_s27 }
  0x13   :  { %p573_p8 = por %p572_p7, %p571_p6 }
  0x15   :  { %p574_p9 = pnand %p573_p8, %p567_p5 }
  0x17   :  { %577 = shalt.err (!%p574_p9)
}
  0x18   :  { %s608_s28 = smov 192   ;;  %s609_s29 = smov 12  }
  0x19   :  { %40 = dma.hbm_to_vmem [thread:$0]  %s681_s3, 3072, %s35_s26, [#allocation7], %s608_s28, %s608_s28, %s609_s29  }
  0x1a   :  { %598 = dma.done.wait [#allocation4], 256  }
  0x1b   :  { %599 = vsyncadd [#allocation4], 4294967040 }
  0x1c   :  { %600 = dma.done.wait [#allocation7], 3072  }
  0x1d   :  { %601 = vsyncadd [#allocation7], 4294964224  ;;  %v54_v0 = vld [vmem:[#allocation3] sm:$0xff]  ;;  %v55_v1 = vld [vmem:[#allocation3 + $0x8] sm:$0xff]  ;;  %v610_v13 = vmov 0.0   ;;  %v611_v35 = vmov 0   ;;  %v143_v54 = vlaneseq }
  0x1e   :  { %56 = vadd.xlane.f32.xlu0 %v54_v0  ;;  %v501_v10 = vld [vmem:[#allocation6 + $0xac] ss:$12 sps:$4 sm:$0xff]   ;;  %v503_v11 = vld [vmem:[#allocation6 + $0xa8] ss:$12 sps:$4 sm:$0xff]   ;;  %v504_v12 = vld [vmem:[#allocation6 + $0xb0] ss:$12 sps:$4 sm:$0xff]   ;;  %471 = vmatprep.subr.bf16.mxu1 %v610_v13 }
  0x1f   :  { %292 = vmatprep.subr.bf16.mxu0 %v501_v10  ;;  %472 = vmatpush3.bf16.msra.mxu1 %v504_v12  ;;  %v505_v14 = vld [vmem:[#allocation6 + $0x94] ss:$12 sps:$4 sm:$0xff]   ;;  %v507_v15 = vld [vmem:[#allocation6 + $0x90] ss:$12 sps:$4 sm:$0xff]   ;;  %v508_v16 = vld [vmem:[#allocation6 + $0x98] ss:$12 sps:$4 sm:$0xff]  }
  0x20   :  { %293 = vmatpush1.bf16.msra.mxu0 %v503_v11  ;;  %473 = vmatprep.subr.bf16.mxu1 %v610_v13  ;;  %v509_v17 = vld [vmem:[#allocation6 + $0x7c] ss:$12 sps:$4 sm:$0xff]   ;;  %v511_v18 = vld [vmem:[#allocation6 + $0x78] ss:$12 sps:$4 sm:$0xff]   ;;  %v512_v19 = vld [vmem:[#allocation6 + $0x80] ss:$12 sps:$4 sm:$0xff]  }
  0x21   :  { %294 = vmatprep.subr.bf16.mxu0 %v505_v14  ;;  %v513_v20 = vld [vmem:[#allocation6 + $0x64] ss:$12 sps:$4 sm:$0xff]   ;;  %v515_v21 = vld [vmem:[#allocation6 + $0x60] ss:$12 sps:$4 sm:$0xff]   ;;  %v516_v22 = vld [vmem:[#allocation6 + $0x68] ss:$12 sps:$4 sm:$0xff]   ;;  %324 = vmatprep.mubr.bf16.mxu0 %v611_v35 }
  0x22   :  { %58 = vadd.xlane.f32.xlu0 %v55_v1  ;;  %v517_v23 = vld [vmem:[#allocation6 + $0x4c] ss:$12 sps:$4 sm:$0xff]   ;;  %v519_v24 = vld [vmem:[#allocation6 + $0x48] ss:$12 sps:$4 sm:$0xff]   ;;  %v520_v25 = vld [vmem:[#allocation6 + $0x50] ss:$12 sps:$4 sm:$0xff]  }
  0x23   :  { %474 = vmatpush3.bf16.msra.mxu1 %v508_v16  ;;  %v521_v26 = vld [vmem:[#allocation6 + $0x34] ss:$12 sps:$4 sm:$0xff]   ;;  %v523_v27 = vld [vmem:[#allocation6 + $0x30] ss:$12 sps:$4 sm:$0xff]   ;;  %v524_v28 = vld [vmem:[#allocation6 + $0x38] ss:$12 sps:$4 sm:$0xff]  }
  0x24   :  { %295 = vmatpush1.bf16.msra.mxu0 %v507_v15  ;;  %475 = vmatprep.subr.bf16.mxu1 %v610_v13  ;;  %v525_v29 = vld [vmem:[#allocation6 + $0x1c] ss:$12 sps:$4 sm:$0xff]   ;;  %v527_v30 = vld [vmem:[#allocation6 + $0x18] ss:$12 sps:$4 sm:$0xff]   ;;  %v528_v31 = vld [vmem:[#allocation6 + $0x20] ss:$12 sps:$4 sm:$0xff]  }
  0x25   :  { %296 = vmatprep.subr.bf16.mxu0 %v509_v17  ;;  %v529_v32 = vld [vmem:[#allocation6 + $0x4] ss:$12 sps:$4 sm:$0xff]   ;;  %v531_v33 = vld [vmem:[#allocation6] ss:$12 sps:$4 sm:$0xff]   ;;  %v532_v34 = vld [vmem:[#allocation6 + $0x8] ss:$12 sps:$4 sm:$0xff]  }
  0x26   :  { %vm612_vm0 = vmmov 0   ;;  %v418_v44 = vld [vmem:[%s679_s1] ss:$0 sm:$0xff]  ;;  %v144_v55 = vshrl.u32 %v143_v54, 7 }
  0x27   :  { %476 = vmatpush3.bf16.msra.mxu1 %v512_v19  ;;  %487 = vmatprep.mubr.msk.bf16.mxu1 %vm612_vm0, %v610_v13  ;;  %v419_v48 = vld [vmem:[%s680_s2] ss:$0 sm:$0xff]  ;;  %s613_s2 = smov [#allocation8]  }
  0x28   :  { %297 = vmatpush1.bf16.msra.mxu0 %v511_v18  ;;  %477 = vmatprep.subr.bf16.mxu1 %v610_v13  ;;  %v153_v56 = vsub.s32 2, %v144_v55  ;;  %v141_v57 = vld [vmem:[%s682_s4] sm:$0x7]  ;;  %v145_v58 = vsub.s32 0, %v144_v55  ;;  %v149_v59 = vsub.s32 1, %v144_v55  ;;  %s405_s4 = sshll.u32 %s613_s2, 4  ;;  %s406_s4 = int_to_ptr.vmem [resolvable:$true] %s405_s4 }
  0x29   :  { %298 = vmatprep.subr.bf16.mxu0 %v513_v20  ;;  %s578_s10 = scalar_lea.vmem %s406_s4, 384  ;;  %p583_p11 = scmp.lt.s32.totalorder %s406_s4, %s406_s4 }
  0x2a   :  { %v154_v60 = vrot.slane %v141_v57, %v153_v56  ;;  %v146_v61 = vrot.slane %v141_v57, %v145_v58  ;;  %v150_v62 = vrot.slane %v141_v57, %v149_v59  ;;  %p579_p10 = scmp.ne.s32.totalorder %s406_s4, %s578_s10  ;;  %p584_p12 = scmp.lt.s32.totalorder %s578_s10, %s578_s10 }
  0x2b   :  { %478 = vmatpush3.bf16.msra.mxu1 %v516_v22 }
  0x2c   :  { %299 = vmatpush1.bf16.msra.mxu0 %v515_v21  ;;  %479 = vmatprep.subr.bf16.mxu1 %v610_v13  ;;  %p585_p13 = por %p584_p12, %p583_p11 }
  0x2d   :  { %300 = vmatprep.subr.bf16.mxu0 %v517_v23 }
  0x2e   :  { %p586_p0 = pnand %p585_p13, %p579_p10 }
  0x2f   :  { %480 = vmatpush3.bf16.msra.mxu1 %v520_v25 }
  0x30   :  { %301 = vmatpush1.bf16.msra.mxu0 %v519_v24  ;;  %481 = vmatprep.subr.bf16.mxu1 %v610_v13 }
  0x31   :  { %302 = vmatprep.subr.bf16.mxu0 %v521_v26 }
  0x33   :  { %482 = vmatpush3.bf16.msra.mxu1 %v524_v28 }
  0x34   :  { %303 = vmatpush1.bf16.msra.mxu0 %v523_v27  ;;  %483 = vmatprep.subr.bf16.mxu1 %v610_v13 }
  0x35   :  { %304 = vmatprep.subr.bf16.mxu0 %v525_v29 }
  0x37   :  { %484 = vmatpush3.bf16.msra.mxu1 %v528_v31 }
  0x38   :  { %305 = vmatpush1.bf16.msra.mxu0 %v527_v30  ;;  %485 = vmatprep.subr.bf16.mxu1 %v610_v13 }
  0x39   :  { %306 = vmatprep.subr.bf16.mxu0 %v529_v32 }
  0x3b   :  { %486 = vmatpush3.bf16.msra.mxu1 %v532_v34 }
  0x3c   :  { %307 = vmatpush1.bf16.msra.mxu0 %v531_v33 }
  0xa7   :  { %v57_v2 = vpop.xlane.xlu0 %56 }
  0xa8   :  { %v61_v3 = vmul.f32 0.0078125, %v57_v2 }
  0xaa   :  { %v653_v4 = vsub.f32 %v54_v0, %v61_v3 }
  0xab   :  { %v59_v5 = vpop.xlane.xlu0 %58 }
  0xac   :  { %v62_v6 = vmul.f32 0.0078125, %v59_v5  ;;  %v65_v7 = vmul.f32 %v653_v4, %v653_v4 }
  0xae   :  { %v657_v8 = vsub.f32 %v55_v1, %v62_v6  ;;  %67 = vadd.xlane.f32.xlu1 %v65_v7 }
  0xb0   :  { %v66_v9 = vmul.f32 %v657_v8, %v657_v8 }
  0xb2   :  { %69 = vadd.xlane.f32.xlu1 %v66_v9 }
 0x137   :  { %v68_v36 = vpop.xlane.xlu1 %67 }
 0x138   :  { %v71_v37 = vmul.f32 0.0078125, %v68_v36 }
 0x13a   :  { %v73_v38 = vadd.f32 1e-05, %v71_v37 }
 0x13b   :  { %v70_v39 = vpop.xlane.xlu1 %69 }
 0x13c   :  { %534 = vrsqrt.f32 %v73_v38  ;;  %v72_v40 = vmul.f32 0.0078125, %v70_v39 }
 0x13e   :  { %v74_v41 = vadd.f32 1e-05, %v72_v40 }
 0x140   :  { %536 = vrsqrt.f32 %v74_v41 }
 0x149   :  { %v535_v42 = vpop.eup %534 }
 0x14a   :  { %v77_v43 = vmul.f32 %v535_v42, %v653_v4 }
 0x14c   :  { %v86_v46 = vmul.f32 %v418_v44, %v77_v43 }
 0x14d   :  { %v537_v45 = vpop.eup %536 }
 0x14e   :  { %v78_v47 = vmul.f32 %v537_v45, %v657_v8  ;;  %v95_v50 = vadd.f32 %v419_v48, %v86_v46 }
 0x150   :  { %v87_v49 = vmul.f32 %v418_v44, %v78_v47 }
 0x152   :  { %v96_v51 = vadd.f32 %v419_v48, %v87_v49 }
 0x154   :  { %v460_v52 = vpack.c.bf16 %v96_v51, %v95_v50 }
 0x156   :  { %461 = vst [vmem:[#allocation2] sm:$0xff] %v460_v52  }
 0x15d   :  { %v533_v53 = vld [vmem:[#allocation2] sm:$0xff]  }
 0x15e   :  { %325 = vmatmul.mubr.bf16.vlgmr.msra.gmra.mxu0 %v533_v53  ;;  %488 = vmatmul.mubr.bf16.vlgmr.msra.gmra.mxu1 %v533_v53 }
 0x21e   :  { %v326_v63 = vpop.f32.mrf.mxu0  ;;  %v369_v0 = vpop.f32.mrf.mxu1 }
 0x21f   :  { %v370_v1 = vadd.f32 %v369_v0, %v154_v60  ;;  %v327_v4 = vadd.f32 %v326_v63, %v146_v61 }
 0x220   :  { %v328_v2 = vpop.f32.mrf.mxu0  ;;  %v489_v3 = vpop.f32.mrf.mxu1 }
 0x221   :  { %v454_v5 = vpack.c.bf16 %v370_v1, %v370_v1  ;;  %v329_v6 = vadd.f32 %v328_v2, %v150_v62 }
 0x222   :  { %v330_v7 = vpop.f32.mrf.mxu0  ;;  %v372_v8 = vpop.f32.mrf.mxu1 }
 0x223   :  { %397 = vst [vmem:[#allocation8 + $0x8] sm:$0xf] %v454_v5  ;;  %v453_v9 = vpack.c.bf16 %v329_v6, %v327_v4  ;;  %v373_v10 = vadd.f32 %v372_v8, %v154_v60  ;;  %v331_v13 = vadd.f32 %v330_v7, %v146_v61 }
 0x224   :  { %v332_v11 = vpop.f32.mrf.mxu0  ;;  %v490_v12 = vpop.f32.mrf.mxu1 }
 0x225   :  { %396 = vst [vmem:[#allocation8] sm:$0xff] %v453_v9  ;;  %v456_v14 = vpack.c.bf16 %v373_v10, %v373_v10  ;;  %v333_v15 = vadd.f32 %v332_v11, %v150_v62 }
 0x227   :  { %399 = vst [vmem:[#allocation8 + $0x14] sm:$0xf] %v456_v14  ;;  %v455_v16 = vpack.c.bf16 %v333_v15, %v331_v13 }
 0x229   :  { %398 = vst [vmem:[#allocation8 + $0xc] sm:$0xff] %v455_v16 }
 0x22a   :  { %589 = shalt.err (!%p586_p0)
}
 0x22b   :  { %411 = dma.vmem_to_hbm [thread:$0]  %s406_s4, 384, %s683_s5, [#allocation5], %s608_s28, %s608_s28, %s609_s29  }
 0x22c   :  { %602 = dma.done.wait [#allocation5], 384  }
 0x22d   :  { %603 = vsyncadd [#allocation5], 4294966912 }
 0x22e   :  { %415 = vsyncpa [#allocation4], 1 }
 0x22f   :  { %416 = vsyncpa [#allocation7], 1 }
 0x230   :  { %417 = vsyncpa [#allocation5], 1 }

</bundles_post_ra>
